<compile_context>
chip_gen: v7x
topology: tpu7x:2x2x1
jax: 0.10.0
libtpu: 0.0.40
codegen_flags: <defaults>
</compile_context>

<pallas_src>
import functools

import jax
import jax.numpy as jnp
from jax import lax
from jax.experimental import pallas as pl
from jax.experimental.pallas import tpu as pltpu


@functools.partial(jax.jit, static_argnames=("padding", "compute_dtype"))
def partial_conv(x_nchw, mask_nchw, w_oihw, bias, *, padding=1,
                 compute_dtype=jnp.bfloat16):
    """PartialConv forward. NCHW in / NCHW out (PyTorch convention)."""
    # TODO(synk): stride/dilation/groups != 1 not implemented (module defaults).
    # TODO(synk): fuse the zero-pad into the kernel (drop the wrapper jnp.pad)
    # and fold the batch onto the lane axis for tiny images to widen the MXU
    # lane extent to a clean multiple of 256/512.
    N, Cin, H, W = x_nchw.shape
    Cout, _, KH, KW = w_oihw.shape
    Hp, Wp = H + 2 * padding, W + 2 * padding
    Ho, Wo = Hp - KH + 1, Wp - KW + 1
    L = Ho * Wp                      # padded-width flattened output length
    K = KH * KW * Cin                # im2col contraction depth (x*m taps only)

    # Extra zero rows at the bottom so every tap's lane-shifted slice of
    # length <= L stays in bounds: need Ptot >= Hp*Wp + (KW - 1).
    extra_rows = pl.cdiv(KW - 1, Wp)
    Ptot = (Hp + extra_rows) * Wp

    f32 = jnp.float32
    pad_cfg = ((0, 0), (0, 0), (padding, padding + extra_rows), (padding, padding))
    xf = jnp.pad(x_nchw.astype(f32), pad_cfg).reshape(N, Cin, Ptot)
    mf = jnp.pad(mask_nchw.astype(f32), pad_cfg).reshape(N, Cin, Ptot)

    # Weight rows ordered (kh, kw, cin) to match the patch row layout.
    w_mat = jnp.transpose(w_oihw.astype(f32), (0, 2, 3, 1)).reshape(Cout, K)
    w_mat = w_mat.astype(compute_dtype)
    b2 = bias.astype(f32).reshape(Cout, 1)

    # --- Spatial (Ho-row) chunking: bound the patch buffer, keep lanes wide.
    LANES_TARGET = 512
    rows_per_chunk = Ho if Wp >= LANES_TARGET else min(Ho, max(1, LANES_TARGET // Wp))
    while rows_per_chunk > 1 and K * rows_per_chunk * Wp * 4 > 8 * (1 << 20):
        rows_per_chunk = max(1, rows_per_chunk // 2)
    chunks = tuple((r0, min(r0 + rows_per_chunk, Ho))
                   for r0 in range(0, Ho, rows_per_chunk))
    Lc_max = rows_per_chunk * Wp

    def kernel(xf_ref, mf_ref, w_ref, b_ref, out_ref, nmask_ref,
               zx_ref, ms_ref, p_ref):
        x = xf_ref[0]                                        # (Cin, Ptot) f32
        m = mf_ref[0]                                        # (Cin, Ptot) f32
        zx_ref[...] = x * m                                  # x*m computed once
        ms_ref[...] = jnp.sum(m, axis=0, keepdims=True)      # (1, Ptot) mask sum
        bias_col = b_ref[...]                                # (Cout, 1), hoisted

        for r0, r1 in chunks:                                # static chunk loop
            Lc = (r1 - r0) * Wp
            base = r0 * Wp

            # im2col: every tap is a contiguous lane slice of the padded,
            # flattened masked input (no per-tap 2-D window slicing).
            for kh in range(KH):
                for kw in range(KW):
                    t = kh * KW + kw
                    s = base + kh * Wp + kw
                    p_ref[t * Cin:(t + 1) * Cin, 0:Lc] = zx_ref[:, s:s + Lc]

            rhs = p_ref[:, 0:Lc]
            if compute_dtype != jnp.float32:
                rhs = rhs.astype(compute_dtype)              # bf16 MXU operands
            acc = jnp.dot(w_ref[...], rhs,
                          preferred_element_type=jnp.float32)  # (Cout, Lc) f32

            # Mask-sum via KH*KW lane-shifted adds on one row (exact, f32).
            msum = ms_ref[:, base:base + Lc]
            for kh in range(KH):
                for kw in range(KW):
                    if kh == 0 and kw == 0:
                        continue
                    s = base + kh * Wp + kw
                    msum = msum + ms_ref[:, s:s + Lc]

            holes = msum == 0.0                              # (1, Lc) bool
            inv = pl.reciprocal(jnp.where(holes, 1.0, msum), approx=True)
            out = jnp.where(holes, 0.0, acc * inv + bias_col)  # (Cout, Lc)
            nm = jnp.where(holes, 0.0, 1.0)                    # (1, Lc)

            out_ref[0, :, base:base + Lc] = out.astype(out_ref.dtype)
            nmask_ref[0, :, base:base + Lc] = nm.astype(nmask_ref.dtype)

    cost = pl.CostEstimate(
        flops=2 * N * Cout * K * L,
        transcendentals=N * L,
        bytes_accessed=4 * (2 * N * Cin * Ptot + N * (Cout + 1) * L
                            + Cout * (K + 1)))

    approx_vmem = (2 * 2 * Cin * Ptot * 4        # double-buffered inputs
                   + 2 * (Cout + 1) * L * 4      # double-buffered outputs
                   + (Cout * K + Cout) * 4       # weights + bias
                   + (Cin + 8) * Ptot * 4        # zx + ms scratch
                   + K * Lc_max * 4)             # im2col patch scratch
    vmem_limit = int(min(64 * (1 << 20), max(32 * (1 << 20), 2 * approx_vmem)))

    out, nmask = pl.pallas_call(
        kernel,
        out_shape=(jax.ShapeDtypeStruct((N, Cout, L), f32),
                   jax.ShapeDtypeStruct((N, 1, L), f32)),
        grid_spec=pltpu.PrefetchScalarGridSpec(
            num_scalar_prefetch=0,
            grid=(N,),
            in_specs=[
                pl.BlockSpec((1, Cin, Ptot), lambda n: (n, 0, 0)),
                pl.BlockSpec((1, Cin, Ptot), lambda n: (n, 0, 0)),
                pl.BlockSpec((Cout, K), lambda n: (0, 0)),
                pl.BlockSpec((Cout, 1), lambda n: (0, 0)),
            ],
            out_specs=[
                pl.BlockSpec((1, Cout, L), lambda n: (n, 0, 0)),
                pl.BlockSpec((1, 1, L), lambda n: (n, 0, 0)),
            ],
            scratch_shapes=[
                pltpu.VMEM((Cin, Ptot), f32),    # zx = x*m   (padded, flattened)
                pltpu.VMEM((1, Ptot), f32),      # ms = sum_c mask (padded, flat)
                pltpu.VMEM((K, Lc_max), f32),    # im2col patch chunk
            ],
        ),
        compiler_params=pltpu.CompilerParams(
            dimension_semantics=("parallel",),
            vmem_limit_bytes=vmem_limit),
        cost_estimate=cost,
    )(xf, mf, w_mat, b2)

    # Free reshape + garbage-column slice; broadcast the single mask row.
    out4 = out.reshape(N, Cout, Ho, Wp)[..., :Wo]
    nm4 = jnp.broadcast_to(nmask.reshape(N, 1, Ho, Wp)[..., :Wo],
                           (N, Cout, Ho, Wo))
    return out4, nm4


def _reference(x, m, w_oihw, bias, padding):
    """Pure-JAX reference matching the PyTorch forward (NCHW)."""
    dn = ("NCHW", "OIHW", "NCHW")
    conv = lax.conv_general_dilated(
        x * m, w_oihw, window_strides=(1, 1),
        padding=((padding, padding), (padding, padding)),
        dimension_numbers=dn)
    out = conv + bias.reshape(1, -1, 1, 1)
    out_mask = lax.conv_general_dilated(
        m, jnp.ones_like(w_oihw), window_strides=(1, 1),
        padding=((padding, padding), (padding, padding)),
        dimension_numbers=dn)
    holes = out_mask == 0.0
    mask_sum = jnp.where(holes, 1.0, out_mask)
    b = bias.reshape(1, -1, 1, 1)
    out = jnp.where(holes, 0.0, (out - b) / mask_sum + b)
    new_mask = jnp.where(holes, 0.0, jnp.ones_like(out))
    return out, new_mask


if __name__ == "__main__":
    # PartialConv(in_channels=4, out_channels=8, kernel_size=3, stride=1, padding=1)
    N, Cin, H, W = 2, 4, 16, 16
    Cout, ksize, padding = 8, 3, 1

    key = jax.random.PRNGKey(0)
    kx, km, kw, kb = jax.random.split(key, 4)

    x = jax.random.normal(kx, (N, Cin, H, W), dtype=jnp.float32)
    # Binary mask with plenty of zeros so some receptive fields are all-hole.
    mask = (jax.random.uniform(km, (N, Cin, H, W)) > 0.8).astype(jnp.float32)

    w = jax.random.normal(kw, (Cout, Cin, ksize, ksize), dtype=jnp.float32) * 0.1
    bias = jax.random.normal(kb, (Cout,), dtype=jnp.float32) * 0.05

    ref_out, ref_mask = _reference(x, mask, w, bias, padding)

    # f32 matmul path (tight tolerance) and bf16-MXU path (bf16-level tolerance).
    for cdt, tol in ((jnp.float32, 1e-3), (jnp.bfloat16, 2.5e-3)):
        out, new_mask = partial_conv(x, mask, w, bias, padding=padding,
                                     compute_dtype=cdt)
        jax.block_until_ready((out, new_mask))
        name = jnp.dtype(cdt).name
        assert out.shape == (N, Cout, H, W) and new_mask.shape == (N, Cout, H, W)
        assert jnp.allclose(out, ref_out, atol=tol, rtol=tol), f"output mismatch ({name})"
        assert jnp.allclose(new_mask, ref_mask, atol=1e-6), f"mask mismatch ({name})"

    print("KERNEL_OK")
</pallas_src>

<mosaic_0001>
module attributes {stable_mosaic.version = 11 : i64} {
  func.func @kernel(%arg0: i32, %arg1: memref<1x4x342xf32, #tpu.memory_space<vmem>>, %arg2: memref<1x4x342xf32, #tpu.memory_space<vmem>>, %arg3: memref<8x36xf32, #tpu.memory_space<vmem>>, %arg4: memref<8x1xf32, #tpu.memory_space<vmem>>, %arg5: memref<1x8x288xf32, #tpu.memory_space<vmem>>, %arg6: memref<1x1x288xf32, #tpu.memory_space<vmem>>, %arg7: memref<4x342xf32, #tpu.memory_space<vmem>>, %arg8: memref<1x342xf32, #tpu.memory_space<vmem>>, %arg9: memref<36x288xf32, #tpu.memory_space<vmem>>) attributes {dimension_semantics = [#tpu.dimension_semantics<parallel>], iteration_bounds = array<i64: 2>, scalar_prefetch = 0 : i64, scratch_operands = 3 : i64, tpu.core_type = #tpu.core_type<tc>, window_params = [{transform_indices = @transform_0, window_bounds = array<i64: 1, 4, 342>}, {transform_indices = @transform_1, window_bounds = array<i64: 1, 4, 342>}, {pipeline_mode = #tpu.pipeline_mode<synchronous>, transform_indices = @transform_2, window_bounds = array<i64: 8, 36>}, {pipeline_mode = #tpu.pipeline_mode<synchronous>, transform_indices = @transform_3, window_bounds = array<i64: 8, 1>}, {transform_indices = @transform_4, window_bounds = array<i64: 1, 8, 288>}, {transform_indices = @transform_5, window_bounds = array<i64: 1, 1, 288>}]} {
    %c0 = arith.constant 0 : index
    %c0_0 = arith.constant 0 : index
    %c0_1 = arith.constant 0 : index
    %0 = vector.load %arg1[%c0, %c0_0, %c0_1] : memref<1x4x342xf32, #tpu.memory_space<vmem>>, vector<1x4x342xf32>
    %1 = vector.shape_cast %0 : vector<1x4x342xf32> to vector<4x342xf32>
    %c0_2 = arith.constant 0 : index
    %c0_3 = arith.constant 0 : index
    %c0_4 = arith.constant 0 : index
    %2 = vector.load %arg2[%c0_2, %c0_3, %c0_4] : memref<1x4x342xf32, #tpu.memory_space<vmem>>, vector<1x4x342xf32>
    %3 = vector.shape_cast %2 : vector<1x4x342xf32> to vector<4x342xf32>
    %4 = arith.mulf %1, %3 : vector<4x342xf32>
    %c0_5 = arith.constant 0 : index
    %c0_6 = arith.constant 0 : index
    %5 = vector.load %arg7[%c0_5, %c0_6] : memref<4x342xf32, #tpu.memory_space<vmem>>, vector<4x342xf32>
    tpu.vector_store %arg7[%c0_5, %c0_6], %4 {strides = array<i32>} : memref<4x342xf32, #tpu.memory_space<vmem>>, vector<4x342xf32>,
    %cst = arith.constant dense<0.000000e+00> : vector<342xf32>
    %6 = vector.multi_reduction <add>, %3, %cst [0] : vector<4x342xf32> to vector<342xf32>
    %7 = vector.shape_cast %6 : vector<342xf32> to vector<1x342xf32>
    %c0_7 = arith.constant 0 : index
    %c0_8 = arith.constant 0 : index
    %8 = vector.load %arg8[%c0_7, %c0_8] : memref<1x342xf32, #tpu.memory_space<vmem>>, vector<1x342xf32>
    tpu.vector_store %arg8[%c0_7, %c0_8], %7 {strides = array<i32>} : memref<1x342xf32, #tpu.memory_space<vmem>>, vector<1x342xf32>,
    %c0_9 = arith.constant 0 : index
    %c0_10 = arith.constant 0 : index
    %9 = vector.load %arg4[%c0_9, %c0_10] : memref<8x1xf32, #tpu.memory_space<vmem>>, vector<8x1xf32>
    %c0_11 = arith.constant 0 : index
    %c0_12 = arith.constant 0 : index
    %10 = vector.load %arg7[%c0_11, %c0_12] : memref<4x342xf32, #tpu.memory_space<vmem>>, vector<4x288xf32>
    %c0_13 = arith.constant 0 : index
    %c0_14 = arith.constant 0 : index
    %11 = vector.load %arg9[%c0_13, %c0_14] : memref<36x288xf32, #tpu.memory_space<vmem>>, vector<4x288xf32>
    tpu.vector_store %arg9[%c0_13, %c0_14], %10 {strides = array<i32>} : memref<36x288xf32, #tpu.memory_space<vmem>>, vector<4x288xf32>,
    %c0_15 = arith.constant 0 : index
    %c1 = arith.constant 1 : index
    %12 = vector.load %arg7[%c0_15, %c1] : memref<4x342xf32, #tpu.memory_space<vmem>>, vector<4x288xf32>
    %c4 = arith.constant 4 : index
    %c0_16 = arith.constant 0 : index
    %13 = vector.load %arg9[%c4, %c0_16] : memref<36x288xf32, #tpu.memory_space<vmem>>, vector<4x288xf32>
    tpu.vector_store %arg9[%c4, %c0_16], %12 {strides = array<i32>} : memref<36x288xf32, #tpu.memory_space<vmem>>, vector<4x288xf32>,
    %c0_17 = arith.constant 0 : index
    %c2 = arith.constant 2 : index
    %14 = vector.load %arg7[%c0_17, %c2] : memref<4x342xf32, #tpu.memory_space<vmem>>, vector<4x288xf32>
    %c8 = arith.constant 8 : index
    %c0_18 = arith.constant 0 : index
    %15 = vector.load %arg9[%c8, %c0_18] : memref<36x288xf32, #tpu.memory_space<vmem>>, vector<4x288xf32>
    tpu.vector_store %arg9[%c8, %c0_18], %14 {strides = array<i32>} : memref<36x288xf32, #tpu.memory_space<vmem>>, vector<4x288xf32>,
    %c0_19 = arith.constant 0 : index
    %c18 = arith.constant 18 : index
    %16 = vector.load %arg7[%c0_19, %c18] : memref<4x342xf32, #tpu.memory_space<vmem>>, vector<4x288xf32>
    %c12 = arith.constant 12 : index
    %c0_20 = arith.constant 0 : index
    %17 = vector.load %arg9[%c12, %c0_20] : memref<36x288xf32, #tpu.memory_space<vmem>>, vector<4x288xf32>
    tpu.vector_store %arg9[%c12, %c0_20], %16 {strides = array<i32>} : memref<36x288xf32, #tpu.memory_space<vmem>>, vector<4x288xf32>,
    %c0_21 = arith.constant 0 : index
    %c19 = arith.constant 19 : index
    %18 = vector.load %arg7[%c0_21, %c19] : memref<4x342xf32, #tpu.memory_space<vmem>>, vector<4x288xf32>
    %c16 = arith.constant 16 : index
    %c0_22 = arith.constant 0 : index
    %19 = vector.load %arg9[%c16, %c0_22] : memref<36x288xf32, #tpu.memory_space<vmem>>, vector<4x288xf32>
    tpu.vector_store %arg9[%c16, %c0_22], %18 {strides = array<i32>} : memref<36x288xf32, #tpu.memory_space<vmem>>, vector<4x288xf32>,
    %c0_23 = arith.constant 0 : index
    %c20 = arith.constant 20 : index
    %20 = vector.load %arg7[%c0_23, %c20] : memref<4x342xf32, #tpu.memory_space<vmem>>, vector<4x288xf32>
    %c20_24 = arith.constant 20 : index
    %c0_25 = arith.constant 0 : index
    %21 = vector.load %arg9[%c20_24, %c0_25] : memref<36x288xf32, #tpu.memory_space<vmem>>, vector<4x288xf32>
    tpu.vector_store %arg9[%c20_24, %c0_25], %20 {strides = array<i32>} : memref<36x288xf32, #tpu.memory_space<vmem>>, vector<4x288xf32>,
    %c0_26 = arith.constant 0 : index
    %c36 = arith.constant 36 : index
    %22 = vector.load %arg7[%c0_26, %c36] : memref<4x342xf32, #tpu.memory_space<vmem>>, vector<4x288xf32>
    %c24 = arith.constant 24 : index
    %c0_27 = arith.constant 0 : index
    %23 = vector.load %arg9[%c24, %c0_27] : memref<36x288xf32, #tpu.memory_space<vmem>>, vector<4x288xf32>
    tpu.vector_store %arg9[%c24, %c0_27], %22 {strides = array<i32>} : memref<36x288xf32, #tpu.memory_space<vmem>>, vector<4x288xf32>,
    %c0_28 = arith.constant 0 : index
    %c37 = arith.constant 37 : index
    %24 = vector.load %arg7[%c0_28, %c37] : memref<4x342xf32, #tpu.memory_space<vmem>>, vector<4x288xf32>
    %c28 = arith.constant 28 : index
    %c0_29 = arith.constant 0 : index
    %25 = vector.load %arg9[%c28, %c0_29] : memref<36x288xf32, #tpu.memory_space<vmem>>, vector<4x288xf32>
    tpu.vector_store %arg9[%c28, %c0_29], %24 {strides = array<i32>} : memref<36x288xf32, #tpu.memory_space<vmem>>, vector<4x288xf32>,
    %c0_30 = arith.constant 0 : index
    %c38 = arith.constant 38 : index
    %26 = vector.load %arg7[%c0_30, %c38] : memref<4x342xf32, #tpu.memory_space<vmem>>, vector<4x288xf32>
    %c32 = arith.constant 32 : index
    %c0_31 = arith.constant 0 : index
    %27 = vector.load %arg9[%c32, %c0_31] : memref<36x288xf32, #tpu.memory_space<vmem>>, vector<4x288xf32>
    tpu.vector_store %arg9[%c32, %c0_31], %26 {strides = array<i32>} : memref<36x288xf32, #tpu.memory_space<vmem>>, vector<4x288xf32>,
    %c0_32 = arith.constant 0 : index
    %c0_33 = arith.constant 0 : index
    %28 = vector.load %arg9[%c0_32, %c0_33] : memref<36x288xf32, #tpu.memory_space<vmem>>, vector<36x288xf32>
    %c0_34 = arith.constant 0 : index
    %c0_35 = arith.constant 0 : index
    %29 = vector.load %arg3[%c0_34, %c0_35] : memref<8x36xf32, #tpu.memory_space<vmem>>, vector<8x36xf32>
    %cst_36 = arith.constant dense<0.000000e+00> : vector<8x288xf32>
    %30 = tpu.matmul %29, %28, %cst_36 {dimension_numbers = #tpu.dot_dimension_numbers<[1], [0], [0], [1], [0, 0, 1, 1], [], []>} : vector<8x36xf32>, vector<36x288xf32>, vector<8x288xf32> -> vector<8x288xf32>
    %c0_37 = arith.constant 0 : index
    %c0_38 = arith.constant 0 : index
    %31 = vector.load %arg8[%c0_37, %c0_38] : memref<1x342xf32, #tpu.memory_space<vmem>>, vector<1x288xf32>
    %c0_39 = arith.constant 0 : index
    %c1_40 = arith.constant 1 : index
    %32 = vector.load %arg8[%c0_39, %c1_40] : memref<1x342xf32, #tpu.memory_space<vmem>>, vector<1x288xf32>
    %33 = arith.addf %31, %32 : vector<1x288xf32>
    %c0_41 = arith.constant 0 : index
    %c2_42 = arith.constant 2 : index
    %34 = vector.load %arg8[%c0_41, %c2_42] : memref<1x342xf32, #tpu.memory_space<vmem>>, vector<1x288xf32>
    %35 = arith.addf %33, %34 : vector<1x288xf32>
    %c0_43 = arith.constant 0 : index
    %c18_44 = arith.constant 18 : index
    %36 = vector.load %arg8[%c0_43, %c18_44] : memref<1x342xf32, #tpu.memory_space<vmem>>, vector<1x288xf32>
    %37 = arith.addf %35, %36 : vector<1x288xf32>
    %c0_45 = arith.constant 0 : index
    %c19_46 = arith.constant 19 : index
    %38 = vector.load %arg8[%c0_45, %c19_46] : memref<1x342xf32, #tpu.memory_space<vmem>>, vector<1x288xf32>
    %39 = arith.addf %37, %38 : vector<1x288xf32>
    %c0_47 = arith.constant 0 : index
    %c20_48 = arith.constant 20 : index
    %40 = vector.load %arg8[%c0_47, %c20_48] : memref<1x342xf32, #tpu.memory_space<vmem>>, vector<1x288xf32>
    %41 = arith.addf %39, %40 : vector<1x288xf32>
    %c0_49 = arith.constant 0 : index
    %c36_50 = arith.constant 36 : index
    %42 = vector.load %arg8[%c0_49, %c36_50] : memref<1x342xf32, #tpu.memory_space<vmem>>, vector<1x288xf32>
    %43 = arith.addf %41, %42 : vector<1x288xf32>
    %c0_51 = arith.constant 0 : index
    %c37_52 = arith.constant 37 : index
    %44 = vector.load %arg8[%c0_51, %c37_52] : memref<1x342xf32, #tpu.memory_space<vmem>>, vector<1x288xf32>
    %45 = arith.addf %43, %44 : vector<1x288xf32>
    %c0_53 = arith.constant 0 : index
    %c38_54 = arith.constant 38 : index
    %46 = vector.load %arg8[%c0_53, %c38_54] : memref<1x342xf32, #tpu.memory_space<vmem>>, vector<1x288xf32>
    %47 = arith.addf %45, %46 : vector<1x288xf32>
    %cst_55 = arith.constant 0.000000e+00 : f32
    %48 = vector.broadcast %cst_55 : f32 to vector<1x288xf32>
    %49 = arith.cmpf oeq, %47, %48 : vector<1x288xf32>
    %cst_56 = arith.constant 1.000000e+00 : f32
    %50 = vector.broadcast %cst_56 : f32 to vector<1x288xf32>
    %51 = arith.select %49, %50, %47 : vector<1x288xi1>, vector<1x288xf32>
    %52 = tpu.reciprocal %51 {approx = true} : vector<1x288xf32> -> vector<1x288xf32>
    %53 = vector.broadcast %52 : vector<1x288xf32> to vector<8x288xf32>
    %54 = arith.mulf %30, %53 : vector<8x288xf32>
    %55 = vector.broadcast %9 : vector<8x1xf32> to vector<8x288xf32>
    %56 = arith.addf %54, %55 : vector<8x288xf32>
    %cst_57 = arith.constant 0.000000e+00 : f32
    %57 = vector.shape_cast %49 : vector<1x288xi1> to vector<1x288xi1>
    %58 = vector.broadcast %57 : vector<1x288xi1> to vector<8x288xi1>
    %59 = vector.broadcast %cst_57 : f32 to vector<8x288xf32>
    %60 = arith.select %58, %59, %56 : vector<8x288xi1>, vector<8x288xf32>
    %cst_58 = arith.constant 0.000000e+00 : f32
    %cst_59 = arith.constant 1.000000e+00 : f32
    %61 = vector.broadcast %cst_58 : f32 to vector<1x288xf32>
    %62 = vector.broadcast %cst_59 : f32 to vector<1x288xf32>
    %63 = arith.select %49, %61, %62 : vector<1x288xi1>, vector<1x288xf32>
    %c0_60 = arith.constant 0 : index
    %c0_61 = arith.constant 0 : index
    %c0_62 = arith.constant 0 : index
    %64 = vector.load %arg5[%c0_60, %c0_61, %c0_62] : memref<1x8x288xf32, #tpu.memory_space<vmem>>, vector<1x8x288xf32>
    %65 = vector.shape_cast %64 : vector<1x8x288xf32> to vector<8x288xf32>
    %66 = vector.shape_cast %60 : vector<8x288xf32> to vector<1x8x288xf32>
    tpu.vector_store %arg5[%c0_60, %c0_61, %c0_62], %66 {strides = array<i32>} : memref<1x8x288xf32, #tpu.memory_space<vmem>>, vector<1x8x288xf32>,
    %c0_63 = arith.constant 0 : index
    %c0_64 = arith.constant 0 : index
    %c0_65 = arith.constant 0 : index
    %67 = vector.load %arg6[%c0_63, %c0_64, %c0_65] : memref<1x1x288xf32, #tpu.memory_space<vmem>>, vector<1x1x288xf32>
    %68 = vector.shape_cast %67 : vector<1x1x288xf32> to vector<1x288xf32>
    %69 = vector.shape_cast %63 : vector<1x288xf32> to vector<1x1x288xf32>
    tpu.vector_store %arg6[%c0_63, %c0_64, %c0_65], %69 {strides = array<i32>} : memref<1x1x288xf32, #tpu.memory_space<vmem>>, vector<1x1x288xf32>,
    return
  }
  func.func @transform_0(%arg0: i32) -> (i32, i32, i32) {
    %c0_i32 = arith.constant 0 : i32
    %c0_i32_0 = arith.constant 0 : i32
    %c0_i32_1 = arith.constant 0 : i32
    return %arg0, %c0_i32, %c0_i32_0 : i32, i32, i32
  }
  func.func @transform_1(%arg0: i32) -> (i32, i32, i32) {
    %c0_i32 = arith.constant 0 : i32
    %c0_i32_0 = arith.constant 0 : i32
    %c0_i32_1 = arith.constant 0 : i32
    return %arg0, %c0_i32, %c0_i32_0 : i32, i32, i32
  }
  func.func @transform_2(%arg0: i32) -> (i32, i32) {
    %c0_i32 = arith.constant 0 : i32
    %c0_i32_0 = arith.constant 0 : i32
    %c0_i32_1 = arith.constant 0 : i32
    return %c0_i32, %c0_i32_0 : i32, i32
  }
  func.func @transform_3(%arg0: i32) -> (i32, i32) {
    %c0_i32 = arith.constant 0 : i32
    %c0_i32_0 = arith.constant 0 : i32
    %c0_i32_1 = arith.constant 0 : i32
    return %c0_i32, %c0_i32_0 : i32, i32
  }
  func.func @transform_4(%arg0: i32) -> (i32, i32, i32) {
    %c0_i32 = arith.constant 0 : i32
    %c0_i32_0 = arith.constant 0 : i32
    %c0_i32_1 = arith.constant 0 : i32
    return %arg0, %c0_i32, %c0_i32_0 : i32, i32, i32
  }
  func.func @transform_5(%arg0: i32) -> (i32, i32, i32) {
    %c0_i32 = arith.constant 0 : i32
    %c0_i32_0 = arith.constant 0 : i32
    %c0_i32_1 = arith.constant 0 : i32
    return %arg0, %c0_i32, %c0_i32_0 : i32, i32, i32
  }
}

</mosaic_0001>

<bundles_post_ra>
// kernel: partial_conv.1
= control target key start
LH: loop header
LB: loop body
LE: loop exit
PB: predicated region body
PF: predicated region fallthrough
CT: control target
= control target key end

     0   :  { %s1004_s18 = smov 0   ;;  %s1159_s0 = inlined_call_operand.vmem [shape: f32[2,4,342], index: 0, kind: input, shape index: {}]   ;;  %s1160_s1 = inlined_call_operand.vmem [shape: f32[2,4,342], index: 1, kind: input, shape index: {}]   ;;  %s1161_s2 = inlined_call_operand.vmem [shape: f32[8,36], index: 2, kind: input, shape index: {}]   ;;  %s1162_s3 = inlined_call_operand.vmem [shape: f32[8,1], index: 3, kind: input, shape index: {}]   ;;  %s1163_s4 = inlined_call_operand.vmem [shape: f32[2,8,288], index: 4, kind: output, shape index: {0}]   ;;  %s1164_s5 = inlined_call_operand.vmem [shape: f32[2,1,288], index: 5, kind: output, shape index: {1}]  }
   0x1 LB: > { %s872_s19 = sadd.s32 4294967295, %s958_s18   ;;  %p876_p0 = scmp.ge.s32.totalorder %s958_s18, 1  ;;  %s958_s18 = sphi %s1004_s18, %s16_s18  }
   0x2   : > { %p200_p1 = scmp.lt.s32.totalorder %s958_s18, 3 }
   0x4   : > { %p201_p2 = pnand %p876_p0, %p200_p1 }
   0x5   : > { %p237_p3 = scmp.lt.s32.totalorder (!%p201_p2), %s872_s19, 1  ;;  %vm263_vm0 = vcmask (!%p201_p2), 699392   ;;  %s960_s27 = smov (!%p201_p2), 127   ;;  %vm330_vm1 = vcmask (!%p201_p2), 257024   ;;  %v965_v12 = vmov (!%p201_p2), 0.0|0.0   ;;  %v968_v17 = vmov (!%p201_p2), 0.0  }
   0x6   : > { %204 = sbr.rel (%p201_p2) target bundleno = 417 (0x1a1), region = 36  ;;  %s961_s28 = smov (!%p201_p2), 110   ;;  %914 = vmatprep.subr.bf16.mxu1 (!%p201_p2), %v965_v12  ;;  %590 = vmatprep.mubr.f32.mxu0 (!%p201_p2), %v968_v17  ;;  %vm969_vm2 = vmmov (!%p201_p2), 0   ;;  %vm268_vm3 = vcmask (!%p201_p2), 1043456   ;;  %v970_v25 = vmov (!%p201_p2), 1966171168   ;;  %v297_v27 = vlaneseq (!%p201_p2) }
   0x7   : > { %s962_s29 = smov (!%p201_p2), 126   ;;  %s963_s30 = smov (!%p201_p2), 109   ;;  %903 = vmatprep.mubr.msk.f32.mxu1 (!%p201_p2), %vm969_vm2, %v968_v17  ;;  %v295_v26 = vunpack.c.l.s4 (!%p201_p2), %v970_v25  ;;  %v972_v39 = vmov (!%p201_p2), 0   ;;  %v322_v54 = vld [vmem:[%s1162_s3] sm:$0xff] (!%p201_p2)  ;;  %vm344_vm5 = vcmask (!%p201_p2), 1039360   ;;  %vm352_vm6 = vcmask (!%p201_p2), 261124  }
   0x8   : > { %s964_s6 = smov (!%p201_p2), 108   ;;  %s966_s7 = smov (!%p201_p2), 92   ;;  %v1074_v35 = vshrl.u32 (!%p201_p2), %v297_v27, 7  ;;  %945 = vset.pattern.permute.xlu0 (!%p201_p2), %v972_v39  ;;  %vm319_vm4 = vcmp.lt.s32.totalorder (!%p201_p2), %v297_v27, 342  ;;  %vm365_vm7 = vcmask (!%p201_p2), 1031168   ;;  %vm386_vm8 = vcmask (!%p201_p2), 900096  }
   0x9   : > { %s967_s8 = smov (!%p201_p2), 91   ;;  %s971_s9 = smov (!%p201_p2), 90   ;;  %v296_v34 = vunpack.c.0.s8 (!%p201_p2), %v295_v26  ;;  %vm427_vm9 = vcmask (!%p201_p2), 883712   ;;  %vm406_vm10 = vcmask (!%p201_p2), 891904   ;;  %vm447_vm11 = vcmask (!%p201_p2), 752640  }
   0xa   : > { %vm468_vm12 = vcmask (!%p201_p2), 744448   ;;  %vm488_vm13 = vcmask (!%p201_p2), 736256   ;;  %vm513_vm14 = vcmask (!%p201_p2), 293888   ;;  %vm771_vm15 = vcmp.lt.s32.totalorder (!%p201_p2), %v297_v27, 288 }
   0xb   : > { %v299_v46 = vsub.s32 (!%p201_p2), %v296_v34, %v1074_v35 }
   0xd   : > { %s1166_s19 = smov (!%p237_p3, %s872_s19), 1 }
   0xe   : > { %s920_s20 = smul.u32 12, %s1166_s19 }
   0xf   : > { %s922_s14 = smul.u32 3, %s1166_s19 }
  0x10   : > { %s241_s23 = scalar_lea.vmem %s1159_s0, %s920_s20  ;;  %s246_s26 = scalar_lea.vmem %s1160_s1, %s920_s20 }
  0x11   : > { %v257_v0 = vld [vmem:[%s241_s23 + $0x8] sm:$0xf]  ;;  %v256_v2 = vld [vmem:[%s241_s23] sm:$0xff]  ;;  %s255_s17 = scalar_lea.vmem %s1164_s5, %s922_s14  ;;  %s921_s20 = smul.u32 24, %s1166_s19 }
  0x12   : > { %v259_v1 = vld [vmem:[%s246_s26 + $0x8] sm:$0xf]  ;;  %v258_v4 = vld [vmem:[%s246_s26] sm:$0xff] }
  0x13   : > { %v261_v3 = vmul.f32 %v259_v1, %v257_v0  ;;  %v1021_v5 = vmul.f32 %v258_v4, %v256_v2  ;;  %v266_v19 = vcombine.high %v258_v4, %v258_v4  ;;  %v269_v20 = vsel %vm268_vm3, %v258_v4, 0.0  ;;  %s251_s23 = scalar_lea.vmem %s1163_s4, %s921_s20 }
  0x14   : > { %v283_v21 = vsel %vm263_vm0, %v259_v1, 0.0  ;;  %v270_v22 = vrot.slane %v269_v20, 4 }
  0x15   : > { %264 = vst.msk [vmem:[#allocation2 + $0x8] sm:$0xf] %vm263_vm0, %v261_v3  ;;  %340 = vrot.lane.b32.xlu0 %v1021_v5, %s960_s27  ;;  %v1028_v6 = vcombine.high %v1021_v5, %v1021_v5  ;;  %328 = vst [vmem:[#allocation4] sm:$0xf] %v1021_v5  ;;  %v336_v11 = vcombine.low %v1021_v5, %v1021_v5  ;;  %v284_v23 = vrot.slane %v283_v21, 4  ;;  %v276_v24 = vsel %vm268_vm3, %v266_v19, 0.0 }
  0x16   : > { %v271_v28 = vadd.f32 %v270_v22, %v269_v20  ;;  %v277_v29 = vrot.slane %v276_v24, 4 }
  0x17   : > { %329 = vst [vmem:[#allocation4 + $0x8] sm:$0xf] %v1028_v6  ;;  %v285_v30 = vadd.f32 %v284_v23, %v283_v21 }
  0x18   : > { %v272_v31 = vrot.slane %v271_v28, 2  ;;  %v278_v32 = vadd.f32 %v277_v29, %v276_v24 }
  0x19   : > { %382 = vrot.lane.b32.xlu0 %v1021_v5, %s961_s28  ;;  %v286_v33 = vrot.slane %v285_v30, 2 }
  0x1a   : > { %v273_v36 = vadd.f32 %v272_v31, %v271_v28  ;;  %v279_v37 = vrot.slane %v278_v32, 2 }
  0x1b   : > { %v287_v38 = vadd.f32 %v286_v33, %v285_v30 }
  0x1c   : > { %v355_v7 = vld [vmem:[#allocation2 + $0x8] sm:$0xf]  ;;  %v274_v40 = vrot.slane %v273_v36, 1  ;;  %v280_v41 = vadd.f32 %v279_v37, %v278_v32 }
  0x1d   : > { %v396_v8 = vld [vmem:[#allocation2 + $0x8] sm:$0xf]  ;;  %363 = vrot.lane.b32.xlu1 %v355_v7, %s962_s29  ;;  %v288_v42 = vrot.slane %v287_v38, 1 }
  0x1e   : > { %404 = vrot.lane.b32.xlu0 %v396_v8, %s963_s30  ;;  %v946_v9 = vld [vmem:[#allocation2 + $0x8] ss:$0 sps:$4 sm:$0xff]   ;;  %v275_v43 = vadd.f32 %v274_v40, %v273_v36  ;;  %v281_v44 = vrot.slane %v280_v41, 1 }
  0x1f   : > { %v324_v10 = vld [vmem:[#allocation2 + $0x8] sm:$0xf]  ;;  %v289_v45 = vadd.f32 %v288_v42, %v287_v38 }
  0x20   : > { %331 = vst.msk [vmem:[#allocation4 + $0x10] sm:$0xf] %vm330_vm1, %v324_v10  ;;  %v947_v13 = vld [vmem:[#allocation2 + $0x8] ss:$0 sps:$4 sm:$0xff]   ;;  %v282_v47 = vadd.f32 %v281_v44, %v280_v41 }
  0x21   : > { %359 = vrot.lane.b32.xlu1 %v1021_v5, %s962_s29  ;;  %v948_v14 = vld [vmem:[#allocation2 + $0x8] ss:$0 sps:$4 sm:$0xff]   ;;  %v307_v49 = vrot.slane %v289_v45, %v299_v46 }
  0x22   : > { %342 = vrot.lane.b32.xlu0 %v946_v9, %s960_s27  ;;  %v437_v15 = vld [vmem:[#allocation2 + $0x8] sm:$0xf]  ;;  %v293_v48 = vcombine.low %v275_v43, %v282_v47 }
  0x23   : > { %v949_v16 = vld [vmem:[#allocation2 + $0x8] ss:$0 sps:$4 sm:$0xff]  }
  0x24   : > { %v478_v18 = vld [vmem:[#allocation2 + $0x8] sm:$0xf]  ;;  %v300_v50 = vrot.slane %v293_v48, %v299_v46 }
  0x25   : > { %423 = vrot.lane.b32.xlu1 %v1021_v5, %s964_s6 }
  0x26   : > { %338 = vrot.lane.b32.xlu0 %v336_v11, %s960_s27  ;;  %v308_v51 = vcombine.low %v300_v50, %v307_v49  ;;  %v512_v49 = vld [vmem:[%s1161_s2] sm:$0xff] }
  0x28   : > { %v315_v52 = vrot.slane %v308_v51, %v299_v46 }
  0x29   : > { %361 = vrot.lane.b32.xlu1 %v1028_v6, %s962_s29 }
  0x2a   : > { %380 = vrot.lane.b32.xlu0 %v336_v11, %s961_s28  ;;  %321 = vst.msk [vmem:[#allocation3] sm:$0x7] %vm319_vm4, %v315_v52 }
  0x2d   : > { %384 = vrot.lane.b32.xlu1 %v947_v13, %s961_s28 }
  0x2e   : > { %425 = vrot.lane.b32.xlu0 %v948_v14, %s964_s6 }
  0x31   : > { %402 = vrot.lane.b32.xlu1 %v1028_v6, %s963_s30  ;;  %v1081_v53 = vld [vmem:[#allocation3] sm:$0x7] }
  0x32   : > { %445 = vrot.lane.b32.xlu0 %v437_v15, %s966_s7 }
  0x35   : > { %443 = vrot.lane.b32.xlu1 %v1028_v6, %s966_s7 }
  0x36   : > { %466 = vrot.lane.b32.xlu0 %v949_v16, %s967_s8 }
  0x39   : > { %464 = vrot.lane.b32.xlu1 %v1021_v5, %s967_s8 }
  0x3a   : > { %421 = vrot.lane.b32.xlu0 %v336_v11, %s964_s6 }
  0x3d   : > { %400 = vrot.lane.b32.xlu1 %v1021_v5, %s963_s30 }
  0x3e   : > { %462 = vrot.lane.b32.xlu0 %v336_v11, %s967_s8 }
  0x41   : > { %441 = vrot.lane.b32.xlu1 %v1021_v5, %s966_s7 }
  0x42   : > { %486 = vrot.lane.b32.xlu0 %v478_v18, %s971_s9 }
  0x45   : > { %484 = vrot.lane.b32.xlu1 %v1028_v6, %s971_s9 }
  0x46   : > { %669 = vrot.lane.b32.xlu0 %v1081_v53, %s960_s27 }
  0x49   : > { %482 = vrot.lane.b32.xlu1 %v1021_v5, %s971_s9 }
  0x4a   : > { %681 = vrot.lane.b32.xlu0 %v1081_v53, %s961_s28 }
  0x4d   : > { %675 = vrot.lane.b32.xlu1 %v1081_v53, %s962_s29 }
  0x4e   : > { %693 = vrot.lane.b32.xlu0 %v1081_v53, %s964_s6 }
  0x51   : > { %687 = vrot.lane.b32.xlu1 %v1081_v53, %s963_s30 }
  0x52   : > { %705 = vrot.lane.b32.xlu0 %v1081_v53, %s967_s8 }
  0x55   : > { %699 = vrot.lane.b32.xlu1 %v1081_v53, %s966_s7 }
  0x56   : > { %741 = vperm.xlu0 %945, %v322_v54  }
  0x59   : > { %711 = vrot.lane.b32.xlu1 %v1081_v53, %s971_s9 }
  0x87   : > { %v341_v55 = vpop.permute.xlu0 %340 }
  0x8b   : > { %v383_v56 = vpop.permute.xlu0 %382 }
  0x8f   : > { %v364_v57 = vpop.permute.xlu1 %363 }
  0x90   : > { %373 = vst.msk [vmem:[#allocation4 + $0x28] sm:$0xf] %vm330_vm1, %v364_v57  ;;  %v405_v58 = vpop.permute.xlu0 %404 }
  0x91   : > { %414 = vst.msk [vmem:[#allocation4 + $0x40] sm:$0xf] %vm330_vm1, %v405_v58 }
  0x93   : > { %v360_v59 = vpop.permute.xlu1 %359 }
  0x94   : > { %v343_v60 = vpop.permute.xlu0 %342 }
  0x95   : > { %v346_v61 = vsel %vm344_vm5, %v341_v55, %v343_v60  ;;  %353 = vst.msk [vmem:[#allocation4 + $0x10] sm:$0xf0] %vm352_vm6, %v343_v60 }
  0x96   : > { %351 = vst [vmem:[#allocation4 + $0x8] sm:$0xf0] %v346_v61 }
  0x97   : > { %v424_v62 = vpop.permute.xlu1 %423 }
  0x98   : > { %v339_v63 = vpop.permute.xlu0 %338 }
  0x99   : > { %v345_v0 = vsel %vm344_vm5, %v339_v63, %v341_v55 }
  0x9a   : > { %350 = vst [vmem:[#allocation4] sm:$0xf0] %v345_v0 }
  0x9b   : > { %v362_v1 = vpop.permute.xlu1 %361 }
  0x9c   : > { %v366_v2 = vsel %vm365_vm7, %v360_v59, %v362_v1  ;;  %v367_v3 = vsel %vm365_vm7, %v362_v1, %v364_v57  ;;  %v381_v4 = vpop.permute.xlu0 %380  ;;  %v499_v15 = vld [vmem:[#allocation4 + $0x10] sm:$0xff] }
  0x9d   : > { %371 = vst [vmem:[#allocation4 + $0x18] sm:$0xf] %v366_v2  ;;  %372 = vst [vmem:[#allocation4 + $0x20] sm:$0xf] %v367_v3  ;;  %v387_v5 = vsel %vm386_vm8, %v381_v4, %v383_v56  ;;  %v498_v21 = vld [vmem:[#allocation4 + $0x8] sm:$0xff] }
  0x9e   : > { %392 = vst [vmem:[#allocation4 + $0x18] sm:$0xf0] %v387_v5 }
  0x9f   : > { %v385_v6 = vpop.permute.xlu1 %384 }
  0xa0   : > { %v388_v7 = vsel %vm386_vm8, %v383_v56, %v385_v6  ;;  %394 = vst.msk [vmem:[#allocation4 + $0x28] sm:$0xf0] %vm352_vm6, %v385_v6  ;;  %v426_v8 = vpop.permute.xlu0 %425 }
  0xa1   : > { %393 = vst [vmem:[#allocation4 + $0x20] sm:$0xf0] %v388_v7  ;;  %v429_v9 = vsel %vm427_vm9, %v424_v62, %v426_v8  ;;  %435 = vst.msk [vmem:[#allocation4 + $0x40] sm:$0xf0] %vm352_vm6, %v426_v8  ;;  %v497_v25 = vld [vmem:[#allocation4] sm:$0xff] }
  0xa2   : > { %434 = vst [vmem:[#allocation4 + $0x38] sm:$0xf0] %v429_v9 }
  0xa3   : > { %v403_v10 = vpop.permute.xlu1 %402 }
  0xa4   : > { %v408_v11 = vsel %vm406_vm10, %v403_v10, %v405_v58  ;;  %v446_v13 = vpop.permute.xlu0 %445 }
  0xa5   : > { %413 = vst [vmem:[#allocation4 + $0x38] sm:$0xf] %v408_v11  ;;  %455 = vst.msk [vmem:[#allocation4 + $0x58] sm:$0xf] %vm330_vm1, %v446_v13  ;;  %v500_v18 = vld [vmem:[#allocation4 + $0x18] sm:$0xff] }
  0xa6   : > { %v908_v26 = vpack.c.bf16 %v500_v18, %v497_v25 }
  0xa7   : > { %v444_v14 = vpop.permute.xlu1 %443  ;;  %v502_v16 = vld [vmem:[#allocation4 + $0x28] sm:$0xff] }
  0xa8   : > { %v915_v19 = vpack.c.bf16 %v502_v16, %v499_v15  ;;  %v449_v20 = vsel %vm447_vm11, %v444_v14, %v446_v13  ;;  %v501_v22 = vld [vmem:[#allocation4 + $0x20] sm:$0xff]  ;;  %v467_v23 = vpop.permute.xlu0 %466 }
  0xa9   : > { %454 = vst [vmem:[#allocation4 + $0x50] sm:$0xf] %v449_v20  ;;  %v906_v24 = vpack.c.bf16 %v501_v22, %v498_v21  ;;  %476 = vst.msk [vmem:[#allocation4 + $0x58] sm:$0xf0] %vm352_vm6, %v467_v23  ;;  %v505_v36 = vld [vmem:[#allocation4 + $0x40] sm:$0xff] }
  0xaa   : > { %916 = vmatpush3.bf16.msra.mxu1 %v915_v19 }
  0xab   : > { %v465_v28 = vpop.permute.xlu1 %464  ;;  %907 = vmatprep.subr.bf16.mxu0 %v906_v24  ;;  %917 = vmatprep.subr.bf16.mxu1 %v965_v12 }
  0xac   : > { %v470_v29 = vsel %vm468_vm12, %v465_v28, %v467_v23  ;;  %909 = vmatpush1.bf16.msra.mxu0 %v908_v26  ;;  %v422_v30 = vpop.permute.xlu0 %421  ;;  %v504_v43 = vld [vmem:[#allocation4 + $0x38] sm:$0xff] }
  0xad   : > { %475 = vst [vmem:[#allocation4 + $0x50] sm:$0xf0] %v470_v29  ;;  %v428_v31 = vsel %vm427_vm9, %v422_v30, %v424_v62 }
  0xae   : > { %433 = vst [vmem:[#allocation4 + $0x30] sm:$0xf0] %v428_v31  ;;  %v731_v31 = vsub.s32 2, %v1074_v35 }
  0xaf   : > { %v401_v32 = vpop.permute.xlu1 %400 }
  0xb0   : > { %v407_v33 = vsel %vm406_vm10, %v401_v32, %v403_v10  ;;  %v463_v34 = vpop.permute.xlu0 %462  ;;  %v508_v37 = vld [vmem:[#allocation4 + $0x58] sm:$0xff] }
  0xb1   : > { %412 = vst [vmem:[#allocation4 + $0x30] sm:$0xf] %v407_v33  ;;  %v469_v38 = vsel %vm468_vm12, %v463_v34, %v465_v28  ;;  %v918_v40 = vpack.c.bf16 %v508_v37, %v505_v36  ;;  %v973_v28 = vmov 1.0  }
  0xb2   : > { %474 = vst [vmem:[#allocation4 + $0x48] sm:$0xf0] %v469_v38 }
  0xb3   : > { %v442_v12 = vpop.permute.xlu1 %441  ;;  %919 = vmatpush3.bf16.msra.mxu1 %v918_v40 }
  0xb4   : > { %v448_v41 = vsel %vm447_vm11, %v442_v12, %v444_v14  ;;  %v487_v42 = vpop.permute.xlu0 %486  ;;  %v507_v44 = vld [vmem:[#allocation4 + $0x50] sm:$0xff]  ;;  %901 = vmatprep.subr.mxu1 %v968_v17  ;;  %v723_v12 = vsub.s32 0, %v1074_v35 }
  0xb5   : > { %453 = vst [vmem:[#allocation4 + $0x48] sm:$0xf] %v448_v41  ;;  %496 = vst.msk [vmem:[#allocation4 + $0x70] sm:$0xf] %vm330_vm1, %v487_v42  ;;  %v910_v45 = vpack.c.bf16 %v507_v44, %v504_v43  ;;  %vm769_vm1 = vcmask 261120  }
  0xb7   : > { %v485_v46 = vpop.permute.xlu1 %484  ;;  %911 = vmatprep.subr.bf16.mxu0 %v910_v45 }
  0xb8   : > { %v490_v47 = vsel %vm488_vm13, %v485_v46, %v487_v42  ;;  %v503_v51 = vld [vmem:[#allocation4 + $0x30] sm:$0xff]  ;;  %v670_v57 = vpop.permute.xlu0 %669  ;;  %v727_v42 = vsub.s32 1, %v1074_v35 }
  0xb9   : > { %495 = vst [vmem:[#allocation4 + $0x68] sm:$0xf] %v490_v47  ;;  %v671_v59 = vrot.slane %v670_v57, 1 }
  0xbb   : > { %v483_v48 = vpop.permute.xlu1 %482  ;;  %v672_v61 = vsel %vm344_vm5, %v670_v57, %v671_v59 }
  0xbc   : > { %v489_v50 = vsel %vm488_vm13, %v483_v48, %v485_v46  ;;  %v506_v17 = vld [vmem:[#allocation4 + $0x48] sm:$0xff]  ;;  %v511_v52 = vld [vmem:[#allocation4 + $0x70] sm:$0xf]  ;;  %v674_v63 = vadd.f32 %v672_v61, %v1081_v53  ;;  %v682_v0 = vpop.permute.xlu0 %681 }
  0xbd   : > { %494 = vst [vmem:[#allocation4 + $0x60] sm:$0xf] %v489_v50  ;;  %v912_v54 = vpack.c.bf16 %v506_v17, %v503_v51  ;;  %902 = vmatpush3.msk.msra.mxu1 %vm268_vm3, %v511_v52  ;;  %v683_v2 = vrot.slane %v682_v0, 1 }
  0xbe   : > { %904 = vmatmul.mubr.msk.f32.vlgmr.msra.gmra.mrb[0].mxu1 %vm513_vm14, %v512_v49 }
  0xbf   : > { %913 = vmatpush1.bf16.msra.mxu0 %v912_v54  ;;  %v676_v58 = vpop.permute.xlu1 %675  ;;  %v684_v5 = vsel %vm386_vm8, %v682_v0, %v683_v2 }
  0xc0   : > { %v510_v55 = vld [vmem:[#allocation4 + $0x68] sm:$0xf]  ;;  %v677_v60 = vrot.slane %v676_v58, 1  ;;  %v694_v8 = vpop.permute.xlu0 %693 }
  0xc1   : > { %880 = vmatprep.subr.msk.mxu0 %vm268_vm3, %v510_v55  ;;  %v695_v10 = vrot.slane %v694_v8, 1 }
  0xc2   : > { %v678_v62 = vsel %vm365_vm7, %v676_v58, %v677_v60 }
  0xc3   : > { %v688_v1 = vpop.permute.xlu1 %687  ;;  %v680_v4 = vadd.f32 %v678_v62, %v674_v63  ;;  %v696_v14 = vsel %vm427_vm9, %v694_v8, %v695_v10 }
  0xc4   : > { %v509_v56 = vld [vmem:[#allocation4 + $0x60] sm:$0xf]  ;;  %v689_v3 = vrot.slane %v688_v1, 1  ;;  %v706_v16 = vpop.permute.xlu0 %705 }
  0xc5   : > { %881 = vmatpush1.msk.msra.mxu0 %vm268_vm3, %v509_v56  ;;  %v686_v7 = vadd.f32 %v684_v5, %v680_v4  ;;  %v707_v19 = vrot.slane %v706_v16, 1 }
  0xc6   : > { %882 = vmatmul.mubr.msk.f32.vlgmr.msra.gmra.mrb[0].mxu0 %vm513_vm14, %v512_v49  ;;  %v690_v6 = vsel %vm406_vm10, %v688_v1, %v689_v3 }
  0xc7   : > { %v700_v9 = vpop.permute.xlu1 %699  ;;  %v692_v13 = vadd.f32 %v690_v6, %v686_v7  ;;  %v708_v22 = vsel %vm468_vm12, %v706_v16, %v707_v19 }
  0xc8   : > { %v701_v11 = vrot.slane %v700_v9, 1 }
  0xc9   : > { %v698_v15 = vadd.f32 %v696_v14, %v692_v13 }
  0xca   : > { %v702_v53 = vsel %vm447_vm11, %v700_v9, %v701_v11 }
  0xcb   : > { %v712_v18 = vpop.permute.xlu1 %711  ;;  %v704_v21 = vadd.f32 %v702_v53, %v698_v15 }
  0xcc   : > { %v713_v20 = vrot.slane %v712_v18, 1 }
  0xcd   : > { %v710_v24 = vadd.f32 %v708_v22, %v704_v21 }
  0xce   : > { %v714_v23 = vsel %vm488_vm13, %v712_v18, %v713_v20 }
  0xcf   : > { %v716_v25 = vadd.f32 %v714_v23, %v710_v24 }
  0xd1   : > { %vm717_vm0 = vcmp.eq.f32.partialorder %v716_v25, 0.0 }
  0xd2   : > { %v718_v26 = vsel %vm717_vm0, 1.0, %v716_v25  ;;  %v766_v29 = vsel %vm717_vm0, 0.0, %v973_v28  ;;  %v747_v32 = vsel %vm717_vm0, 1, %v972_v39 }
  0xd3   : > { %773 = vst.msk [vmem:[%s255_s17] sm:$0x7] %vm771_vm15, %v766_v29  ;;  %950 = vrcp.f32 %v718_v26  ;;  %v759_v36 = vrot.slane %v747_v32, %v731_v31  ;;  %v751_v44 = vrot.slane %v747_v32, %v723_v12  ;;  %v755_v48 = vrot.slane %v747_v32, %v727_v42 }
  0xd5   : > { %v742_v37 = vpop.permute.xlu0 %741  ;;  %vm762_vm2 = vcmp.eq.s32.totalorder %v759_v36, 1  ;;  %vm760_vm3 = vcmp.eq.s32.totalorder %v751_v44, 1  ;;  %vm761_vm4 = vcmp.eq.s32.totalorder %v755_v48, 1 }
  0xdd   : > { %v951_v30 = vpop.eup %950 }
  0xde   : > { %v732_v33 = vrot.slane %v951_v30, %v731_v31  ;;  %v724_v39 = vrot.slane %v951_v30, %v723_v12  ;;  %v728_v45 = vrot.slane %v951_v30, %v727_v42 }
 0x191   : > { %v663_v34 = vpop.f32.mrb[0].mxu1 }
 0x192   : > { %v738_v38 = vmul.f32 %v732_v33, %v663_v34  ;;  %v905_v40 = vpop.f32.mrb[1].mxu1 }
 0x194   : > { %v746_v27 = vadd.f32 %v742_v37, %v738_v38 }
 0x196   : > { %v765_v41 = vsel %vm762_vm2, 0.0, %v746_v27 }
 0x197   : > { %770 = vst.msk [vmem:[%s251_s23 + $0x10] sm:$0xff] %vm769_vm1, %v765_v41 }
 0x199   : > { %v592_v43 = vpop.f32.mrb[0].mxu0 }
 0x19a   : > { %v736_v46 = vmul.f32 %v724_v39, %v592_v43  ;;  %v594_v47 = vpop.f32.mrb[1].mxu0 }
 0x19b   : > { %v737_v49 = vmul.f32 %v728_v45, %v594_v47 }
 0x19c   : > { %v744_v50 = vadd.f32 %v742_v37, %v736_v46 }
 0x19d   : > { %v745_v51 = vadd.f32 %v742_v37, %v737_v49 }
 0x19e   : > { %v763_v17 = vsel %vm760_vm3, 0.0, %v744_v50 }
 0x19f   : > { %767 = vst [vmem:[%s251_s23] sm:$0xff] %v763_v17  ;;  %v764_v52 = vsel %vm761_vm4, 0.0, %v745_v51 }
 0x1a0   : > { %768 = vst [vmem:[%s251_s23 + $0x8] sm:$0xff] %v764_v52 }
 0x1a1 PF: > { %s16_s18 = sadd.s32 1, %s958_s18  }
 0x1a2   : > { %p13_p4 = scmp.ge.s32.totalorder %s16_s18, 4  }
 0x1a4   :  { %15 = sbr.rel (!%p13_p4) target bundleno = 1 (0x1), region = 81 }

</bundles_post_ra>
